<compile_context>
chip_gen: v6e
topology: v6e:2x2x1
jax: 0.10.0
libtpu: 0.0.40
codegen_flags: <defaults>
</compile_context>

<pallas_src>
import jax
import jax.numpy as jnp
from jax.experimental import pallas as pl
from jax.experimental.pallas import tpu as pltpu

LANE = 128            # vreg lane width
MAX_COL_TILE = 2048   # (node, channel) columns per grid step


def _silu(x):
    # x * sigmoid(x) == 0.5 * x * (1 + tanh(0.5 * x)); tanh is one EUP op.
    return 0.5 * x * (1.0 + jnp.tanh(0.5 * x))


def _separable_s2_kernel(g_to_ref, g_from_t_ref, x_ref, s_ref, o_ref):
    # g_to_ref:     (P, I)  to-grid matrix      (resident across grid steps)
    # g_from_t_ref: (I, P)  from-grid matrix, pre-transposed (resident)
    # x_ref:        (I, TC) SH coefficients for TC (node, channel) columns
    # s_ref:        (1, TC) scalar (l=0) channel for the same columns
    # o_ref:        (I, TC)
    x = x_ref[...].astype(jnp.float32)

    # to-grid: (P, I) @ (I, TC) -> (P, TC), then pointwise SiLU on the grid.
    xg = jnp.dot(g_to_ref[...].astype(jnp.float32), x,
                 preferred_element_type=jnp.float32)
    xg = _silu(xg)

    # from-grid: (I, P) @ (P, TC) -> (I, TC).
    res = jnp.dot(g_from_t_ref[...].astype(jnp.float32), xg,
                  preferred_element_type=jnp.float32)
    o_ref[...] = res.astype(o_ref.dtype)

    # Row 0 of the output is the separable scalar path: SiLU(input_scalars).
    s_act = _silu(s_ref[...].astype(jnp.float32))
    o_ref[0:1, :] = s_act.astype(o_ref.dtype)


@jax.jit
def separable_s2_activation(input_scalars, input_tensors, to_grid_mat, from_grid_mat):
    """input_scalars: (N, C); input_tensors: (N, I, C); *_grid_mat: (B, A, I)."""
    N, I, C = input_tensors.shape
    B, A, _ = to_grid_mat.shape
    P = B * A
    NC = N * C
    out_dtype = input_tensors.dtype

    g_to = to_grid_mat.reshape(P, I)                     # (P, I)
    g_from_t = from_grid_mat.reshape(P, I).T             # (I, P)

    # Lane-dense slab: rows = SH coefficients, columns = (node, channel).
    x_t = jnp.transpose(input_tensors, (1, 0, 2)).reshape(I, NC)
    s_t = input_scalars.reshape(1, NC).astype(out_dtype)

    # Column tile: as large as possible to amortize per-step overhead, but keep
    # >=2 grid steps when possible so the parallel axis shards across v7x's TCs.
    nc_lane = pl.cdiv(NC, LANE) * LANE
    col_tile = min(MAX_COL_TILE, nc_lane)
    if nc_lane // col_tile < 2 and nc_lane > LANE:
        col_tile = max(LANE, pl.cdiv(nc_lane // 2, LANE) * LANE)
    nc_pad = pl.cdiv(NC, col_tile) * col_tile

    if nc_pad != NC:  # fast path: no pad / no output slice when NC already tiles
        x_t = jnp.pad(x_t, ((0, 0), (0, nc_pad - NC)))
        s_t = jnp.pad(s_t, ((0, 0), (0, nc_pad - NC)))

    grid = (nc_pad // col_tile,)
    out2d = pl.pallas_call(
        _separable_s2_kernel,
        out_shape=jax.ShapeDtypeStruct((I, nc_pad), out_dtype),
        grid_spec=pltpu.PrefetchScalarGridSpec(
            num_scalar_prefetch=0,
            grid=grid,
            in_specs=[
                pl.BlockSpec((P, I), lambda j: (0, 0)),          # g_to (resident)
                pl.BlockSpec((I, P), lambda j: (0, 0)),          # g_from^T (resident)
                pl.BlockSpec((I, col_tile), lambda j: (0, j)),   # x columns
                pl.BlockSpec((1, col_tile), lambda j: (0, j)),   # scalar columns
            ],
            out_specs=pl.BlockSpec((I, col_tile), lambda j: (0, j)),
        ),
        compiler_params=pltpu.CompilerParams(
            dimension_semantics=("parallel",),
        ),
        input_output_aliases={2: 0},  # donate the x slab -> no second HBM slab
    )(g_to, g_from_t, x_t, s_t)

    if nc_pad != NC:
        out2d = out2d[:, :NC]
    return jnp.transpose(out2d.reshape(I, N, C), (1, 0, 2))


def _reference(input_scalars, input_tensors, to_grid_mat, from_grid_mat):
    hp = jax.lax.Precision.HIGHEST
    out_scalars = jax.nn.silu(input_scalars)[:, None, :]
    x_grid = jnp.einsum('bai,zic->zbac', to_grid_mat, input_tensors, precision=hp)
    x_grid = jax.nn.silu(x_grid)
    out_tensors = jnp.einsum('bai,zbac->zic', from_grid_mat, x_grid, precision=hp)
    return jnp.concatenate([out_scalars, out_tensors[:, 1:, :]], axis=1)


if __name__ == "__main__":
    key = jax.random.PRNGKey(0)
    lmax = mmax = 2
    num_coeffs = (lmax + 1) ** 2      # I = 9 spherical-harmonic coefficients
    res_b, res_a = 6, 7               # small S2 grid -> P = 42 grid points
    n_nodes, channels = 8, 64         # N * C = 512 lane-dense columns

    k1, k2, k3, k4 = jax.random.split(key, 4)
    input_scalars = jax.random.normal(k1, (n_nodes, channels), dtype=jnp.float32)
    input_tensors = jax.random.normal(k2, (n_nodes, num_coeffs, channels),
                                      dtype=jnp.float32)
    # Stand-ins for SO3_grid[lmax][mmax].get_to_grid_mat()/get_from_grid_mat().
    to_grid_mat = jax.random.normal(k3, (res_b, res_a, num_coeffs), dtype=jnp.float32)
    from_grid_mat = jax.random.normal(k4, (res_b, res_a, num_coeffs), dtype=jnp.float32)

    out = separable_s2_activation(input_scalars, input_tensors,
                                  to_grid_mat, from_grid_mat)
    out = jax.block_until_ready(out)

    ref = _reference(input_scalars, input_tensors, to_grid_mat, from_grid_mat)
    assert out.shape == (n_nodes, num_coeffs, channels)
    assert out.dtype == input_tensors.dtype

    # Scalar (l=0) path is pure elementwise -> tight check.
    assert jnp.allclose(out[:, 0, :], jax.nn.silu(input_scalars), atol=1e-5, rtol=1e-5)

    # Tensor path goes through two MXU contractions; compare against the
    # HIGHEST-precision reference at matmul-precision scale.
    scale = float(jnp.max(jnp.abs(ref)))
    max_err = float(jnp.max(jnp.abs(out - ref)))
    assert max_err <= 2e-2 * scale, (max_err, scale)

    print("KERNEL_OK")
</pallas_src>

<mosaic_0001>
module attributes {stable_mosaic.version = 11 : i64} {
  func.func @_separable_s2_kernel(%arg0: i32, %arg1: memref<42x9xf32, #tpu.memory_space<vmem>>, %arg2: memref<9x42xf32, #tpu.memory_space<vmem>>, %arg3: memref<9x256xf32, #tpu.memory_space<vmem>>, %arg4: memref<1x256xf32, #tpu.memory_space<vmem>>, %arg5: memref<9x256xf32, #tpu.memory_space<vmem>>) attributes {dimension_semantics = [#tpu.dimension_semantics<parallel>], iteration_bounds = array<i64: 2>, scalar_prefetch = 0 : i64, scratch_operands = 0 : i64, tpu.core_type = #tpu.core_type<tc>, window_params = [{pipeline_mode = #tpu.pipeline_mode<synchronous>, transform_indices = @transform_0, window_bounds = array<i64: 42, 9>}, {pipeline_mode = #tpu.pipeline_mode<synchronous>, transform_indices = @transform_1, window_bounds = array<i64: 9, 42>}, {transform_indices = @transform_2, window_bounds = array<i64: 9, 256>}, {transform_indices = @transform_3, window_bounds = array<i64: 1, 256>}, {transform_indices = @transform_4, window_bounds = array<i64: 9, 256>}]} {
    %c0 = arith.constant 0 : index
    %c0_0 = arith.constant 0 : index
    %0 = vector.load %arg3[%c0, %c0_0] : memref<9x256xf32, #tpu.memory_space<vmem>>, vector<9x256xf32>
    %c0_1 = arith.constant 0 : index
    %c0_2 = arith.constant 0 : index
    %1 = vector.load %arg1[%c0_1, %c0_2] : memref<42x9xf32, #tpu.memory_space<vmem>>, vector<42x9xf32>
    %cst = arith.constant dense<0.000000e+00> : vector<42x256xf32>
    %2 = tpu.matmul %1, %0, %cst {dimension_numbers = #tpu.dot_dimension_numbers<[1], [0], [0], [1], [0, 0, 1, 1], [], []>} : vector<42x9xf32>, vector<9x256xf32>, vector<42x256xf32> -> vector<42x256xf32>
    %cst_3 = arith.constant 5.000000e-01 : f32
    %3 = vector.broadcast %cst_3 : f32 to vector<42x256xf32>
    %4 = arith.mulf %3, %2 : vector<42x256xf32>
    %cst_4 = arith.constant 5.000000e-01 : f32
    %5 = vector.broadcast %cst_4 : f32 to vector<42x256xf32>
    %6 = arith.mulf %5, %2 : vector<42x256xf32>
    %7 = math.tanh %6 : vector<42x256xf32>
    %cst_5 = arith.constant 1.000000e+00 : f32
    %8 = vector.broadcast %cst_5 : f32 to vector<42x256xf32>
    %9 = arith.addf %8, %7 : vector<42x256xf32>
    %10 = arith.mulf %4, %9 : vector<42x256xf32>
    %c0_6 = arith.constant 0 : index
    %c0_7 = arith.constant 0 : index
    %11 = vector.load %arg2[%c0_6, %c0_7] : memref<9x42xf32, #tpu.memory_space<vmem>>, vector<9x42xf32>
    %cst_8 = arith.constant dense<0.000000e+00> : vector<9x256xf32>
    %12 = tpu.matmul %11, %10, %cst_8 {dimension_numbers = #tpu.dot_dimension_numbers<[1], [0], [0], [1], [0, 0, 1, 1], [], []>} : vector<9x42xf32>, vector<42x256xf32>, vector<9x256xf32> -> vector<9x256xf32>
    %c0_9 = arith.constant 0 : index
    %c0_10 = arith.constant 0 : index
    %13 = vector.load %arg5[%c0_9, %c0_10] : memref<9x256xf32, #tpu.memory_space<vmem>>, vector<9x256xf32>
    tpu.vector_store %arg5[%c0_9, %c0_10], %12 {strides = array<i32>} : memref<9x256xf32, #tpu.memory_space<vmem>>, vector<9x256xf32>,
    %c0_11 = arith.constant 0 : index
    %c0_12 = arith.constant 0 : index
    %14 = vector.load %arg4[%c0_11, %c0_12] : memref<1x256xf32, #tpu.memory_space<vmem>>, vector<1x256xf32>
    %cst_13 = arith.constant 5.000000e-01 : f32
    %15 = vector.broadcast %cst_13 : f32 to vector<1x256xf32>
    %16 = arith.mulf %15, %14 : vector<1x256xf32>
    %cst_14 = arith.constant 5.000000e-01 : f32
    %17 = vector.broadcast %cst_14 : f32 to vector<1x256xf32>
    %18 = arith.mulf %17, %14 : vector<1x256xf32>
    %19 = math.tanh %18 : vector<1x256xf32>
    %cst_15 = arith.constant 1.000000e+00 : f32
    %20 = vector.broadcast %cst_15 : f32 to vector<1x256xf32>
    %21 = arith.addf %20, %19 : vector<1x256xf32>
    %22 = arith.mulf %16, %21 : vector<1x256xf32>
    %c0_16 = arith.constant 0 : index
    %c0_17 = arith.constant 0 : index
    %23 = vector.load %arg5[%c0_16, %c0_17] : memref<9x256xf32, #tpu.memory_space<vmem>>, vector<1x256xf32>
    tpu.vector_store %arg5[%c0_16, %c0_17], %22 {strides = array<i32>} : memref<9x256xf32, #tpu.memory_space<vmem>>, vector<1x256xf32>,
    return
  }
  func.func @transform_0(%arg0: i32) -> (i32, i32) {
    %c0_i32 = arith.constant 0 : i32
    %c0_i32_0 = arith.constant 0 : i32
    %c0_i32_1 = arith.constant 0 : i32
    return %c0_i32, %c0_i32_0 : i32, i32
  }
  func.func @transform_1(%arg0: i32) -> (i32, i32) {
    %c0_i32 = arith.constant 0 : i32
    %c0_i32_0 = arith.constant 0 : i32
    %c0_i32_1 = arith.constant 0 : i32
    return %c0_i32, %c0_i32_0 : i32, i32
  }
  func.func @transform_2(%arg0: i32) -> (i32, i32) {
    %c0_i32 = arith.constant 0 : i32
    %c0_i32_0 = arith.constant 0 : i32
    return %c0_i32, %arg0 : i32, i32
  }
  func.func @transform_3(%arg0: i32) -> (i32, i32) {
    %c0_i32 = arith.constant 0 : i32
    %c0_i32_0 = arith.constant 0 : i32
    return %c0_i32, %arg0 : i32, i32
  }
  func.func @transform_4(%arg0: i32) -> (i32, i32) {
    %c0_i32 = arith.constant 0 : i32
    %c0_i32_0 = arith.constant 0 : i32
    return %c0_i32, %arg0 : i32, i32
  }
}

</mosaic_0001>

<bundles_post_ra>
// kernel: separable_s2_activation.1
= control target key start
LH: loop header
LB: loop body
LE: loop exit
PB: predicated region body
PF: predicated region fallthrough
CT: control target
= control target key end

     0   :  { %s761_s15 = smov 0   ;;  %s763_s16 = smov 0   ;;  %s867_s0 = inlined_call_operand.vmem [shape: f32[42,9], index: 0, kind: input, shape index: {}]   ;;  %s868_s1 = inlined_call_operand.vmem [shape: f32[9,42], index: 1, kind: input, shape index: {}]   ;;  %s869_s2 = inlined_call_operand.vmem [shape: f32[9,512], index: 2, kind: input, shape index: {}, may-alias: {2,4}]   ;;  %s870_s3 = inlined_call_operand.vmem [shape: f32[1,512], index: 3, kind: input, shape index: {}]   ;;  %s871_s4 = inlined_call_operand.vmem [shape: f32[9,512], index: 4, kind: output, shape index: {}, may-alias: {2,4}]  }
   0x1   :  { %s765_s17 = smov 0  }
   0x2 LB: > { %s777_s18 = sadd.s32 4294967295, %s733_s17   ;;  %s780_s19 = sadd.s32 1, %s733_s17   ;;  %s733_s17 = sphi %s765_s17, %s875_s17   ;;  %s729_s16 = sphi %s763_s16, %s874_s16   ;;  %s725_s15 = sphi %s761_s15, %s873_s15  }
   0x3   : > { %s60_s20 = ssub.s32 %s733_s17, %s780_s19  ;;  %s63_s21 = sadd.s32 1, %s729_s16 }
   0x4   : > { %p61_p0 = scmp.eq.s32.totalorder %s60_s20, 0  ;;  %p70_p1 = scmp.ne.s32.totalorder %s729_s16, %s725_s15 }
   0x5   : > { %p71_p2 = scmp.eq.s32.totalorder %s733_s17, 0  ;;  %p126_p3 = scmp.eq.s32.totalorder %s777_s18, 1 }
   0x6   : > { %s790_s22 = scalar_select %p61_p0, %s729_s16, %s63_s21  }
   0x7   : > { %p72_p4 = por %p71_p2, %p70_p1  ;;  %p792_p5 = por %p126_p3, %p70_p1 }
   0x8   : > { %p633_p6 = scmp.ge.s32.totalorder %s733_s17, 2 }
   0xa   : > { %154 = sbr.rel (%p633_p6) target bundleno = 21 (0x15), region = 24 }
   0xf   : > { %157 = sbr.rel (!%p72_p4) target bundleno = 21 (0x15), region = 28  ;;  %s159_s24 = sand.u32 (%p72_p4), 1, %s729_s16  }
  0x10   : > { %s658_s25 = sshll.u32 (%p72_p4), %s733_s17, 4  ;;  %s634_s26 = sshll.u32 (%p72_p4), %s159_s24, 5 }
  0x11   : > { %s164_s29 = scalar_lea.vmem (%p72_p4), %s869_s2, %s658_s25  ;;  %s161_s30 = scalar_lea.vmem (%p72_p4), [#allocation2], %s634_s26 }
  0x12   : > { %v177_v0 = vld [vmem:[%s164_s29] sm:$0xff] (%p72_p4)  ;;  %v179_v1 = vld [vmem:[%s164_s29 + $0x8] sm:$0xff] (%p72_p4) }
  0x13   : > { %v181_v2 = vld [vmem:[%s164_s29 + $0x20] sm:$0xff] (%p72_p4)  ;;  %178 = vst [vmem:[%s161_s30] sm:$0xff] (%p72_p4), %v177_v0  ;;  %180 = vst [vmem:[%s161_s30 + $0x8] sm:$0xff] (%p72_p4), %v179_v1  ;;  %v183_v3 = vld [vmem:[%s164_s29 + $0x28] sm:$0xff] (%p72_p4) }
  0x14   : > { %182 = vst [vmem:[%s161_s30 + $0x10] sm:$0xff] %v181_v2  ;;  %184 = vst [vmem:[%s161_s30 + $0x18] sm:$0xff] %v183_v3 }
  0x15 PF: > { %p637_p7 = scmp.ge.s32.totalorder %s733_s17, 1  ;;  %p197_p8 = scmp.lt.s32.totalorder %s733_s17, 3 }
  0x17   : > { %p198_p9 = pnand %p637_p7, %p197_p8 }
  0x18   : > { %s204_s5 = sand.u32 (!%p198_p9), 1, %s725_s15   ;;  %s640_s29 = sshll.u32 (!%p198_p9), %s777_s18, 1 }
  0x19   : > { %201 = sbr.rel (%p198_p9) target bundleno = 491 (0x1eb), region = 55  ;;  %s805_s6 = sshll.u32 (!%p198_p9), %s204_s5, 5 }
  0x1a   : > { %s206_s7 = scalar_lea.vmem (!%p198_p9), [#allocation2], %s805_s6  ;;  %p234_p10 = scmp.lt.s32.totalorder (!%p198_p9), %s640_s29, 3 }
  0x1b   : > { %s231_s8 = scalar_lea.vmem (!%p198_p9), [#allocation3], %s805_s6 }
  0x1e   : > { %vm268_vm0 = vcmask 1040384   ;;  %v735_v4 = vmov 0.0   ;;  %v242_v5 = vld [vmem:[%s206_s7 + $0x18] sm:$0x1]  ;;  %v241_v6 = vld [vmem:[%s206_s7 + $0x10] sm:$0x1] }
  0x1f   : > { %339 = vmatprep.mubr.f32.mxu0 %v735_v4  ;;  %504 = vmatprep.mubr.f32.mxu1 %v735_v4  ;;  %v240_v7 = vld [vmem:[%s206_s7 + $0x8] sm:$0xff]  ;;  %v239_v8 = vld [vmem:[%s206_s7] sm:$0xff]  ;;  %vm249_vm1 = vcmask 72704   ;;  %v245_v11 = vld [vmem:[%s867_s0 + $0x10] sm:$0xff]  ;;  %vm433_vm2 = vcmask 1041408   ;;  %vm426_vm3 = vcmask 343040  }
  0x20   : > { %641 = vmatprep.subr.msk.mxu0 %vm268_vm0, %v242_v5  ;;  %v243_v9 = vld [vmem:[%s867_s0] sm:$0xff]  ;;  %v244_v10 = vld [vmem:[%s867_s0 + $0x8] sm:$0xff]  ;;  %v246_v12 = vld [vmem:[%s867_s0 + $0x18] sm:$0xff]  ;;  %s877_s29 = smov (!%p234_p10, %s640_s29), 3  ;;  %s659_s9 = sshll.u32 (%p792_p5), %s777_s18, 4 }
  0x21   : > { %642 = vmatpush1.msk.msra.mxu0 %vm268_vm0, %v241_v6  ;;  %v247_v13 = vld [vmem:[%s867_s0 + $0x20] sm:$0xff]  ;;  %v248_v14 = vld [vmem:[%s867_s0 + $0x28] sm:$0x3]  ;;  %s236_s7 = scalar_lea.vmem %s870_s3, %s877_s29  ;;  %s541_s6 = scalar_lea.vmem (%p792_p5), %s871_s4, %s659_s9 }
  0x22   : > { %305 = vmatprep.subr.mxu0 %v240_v7 }
  0x23   : > { %306 = vmatpush1.msra.mxu0 %v239_v8 }
  0x24   : > { %643 = vmatmul.mubr.msk.f32.vlgmr.msra.gmra.mxu0 %vm249_vm1, %v243_v9 }
  0x25   : > { %345 = vmatprep.mubr.f32.mxu0 %v735_v4 }
  0x28   : > { %644 = vmatmul.mubr.msk.f32.gmra.mxu0 %vm249_vm1, %v244_v10 }
  0x29   : > { %351 = vmatprep.mubr.f32.mxu0 %v735_v4 }
  0x2c   : > { %645 = vmatmul.mubr.msk.f32.gmra.mxu0 %vm249_vm1, %v245_v11 }
  0x2d   : > { %357 = vmatprep.mubr.f32.mxu0 %v735_v4 }
  0x30   : > { %646 = vmatmul.mubr.msk.f32.gmra.mxu0 %vm249_vm1, %v246_v12  ;;  %v424_v12 = vld [vmem:[%s868_s1] sm:$0xff] }
  0x31   : > { %363 = vmatprep.mubr.f32.mxu0 %v735_v4 }
  0x34   : > { %647 = vmatmul.mubr.msk.f32.gmra.mxu0 %vm249_vm1, %v247_v13  ;;  %v425_v13 = vld [vmem:[%s868_s1 + $0x8] sm:$0x1] }
  0x35   : > { %369 = vmatprep.mubr.f32.mxu0 %v735_v4 }
  0x38   : > { %648 = vmatmul.mubr.msk.f32.gmra.mxu0 %vm249_vm1, %v248_v14  ;;  %v521_v14 = vld [vmem:[%s236_s7] sm:$0x3] }
  0xe4   : > { %v341_v15 = vpop.f32.mrf.mxu0 }
  0xe5   : > { %v376_v38 = vmul.f32 0.5, %v341_v15  ;;  %v522_v15 = vmul.f32 0.5, %v521_v14 }
  0xe6   : > { %v343_v16 = vpop.f32.mrf.mxu0 }
  0xe7   : > { %v377_v37 = vmul.f32 0.5, %v343_v16 }
  0xe8   : > { %v347_v17 = vpop.f32.mrf.mxu0 }
  0xe9   : > { %v378_v36 = vmul.f32 0.5, %v347_v17 }
  0xea   : > { %v349_v18 = vpop.f32.mrf.mxu0 }
  0xeb   : > { %v379_v35 = vmul.f32 0.5, %v349_v18  ;;  %v526_v18 = vlaneseq }
  0xec   : > { %v353_v19 = vpop.f32.mrf.mxu0 }
  0xed   : > { %v380_v34 = vmul.f32 0.5, %v353_v19  ;;  %vm528_vm4 = vcmp.lt.s32.totalorder %v526_v18, 256 }
  0xee   : > { %v355_v20 = vpop.f32.mrf.mxu0 }
  0xef   : > { %v381_v32 = vmul.f32 0.5, %v355_v20 }
  0xf0   : > { %v359_v21 = vpop.f32.mrf.mxu0 }
  0xf1   : > { %v382_v30 = vmul.f32 0.5, %v359_v21 }
  0xf2   : > { %v361_v22 = vpop.f32.mrf.mxu0 }
  0xf3   : > { %v383_v24 = vmul.f32 0.5, %v361_v22 }
  0xf4   : > { %v365_v23 = vpop.f32.mrf.mxu0 }
  0xf5   : > { %v384_v27 = vmul.f32 0.5, %v365_v23  ;;  %685 = vtanh.f32 %v383_v24 }
  0xf6   : > { %v367_v25 = vpop.f32.mrf.mxu0 }
  0xf7   : > { %v385_v26 = vmul.f32 0.5, %v367_v25 }
  0xf8   : > { %v371_v28 = vpop.f32.mrf.mxu0 }
  0xf9   : > { %v386_v29 = vmul.f32 0.5, %v371_v28  ;;  %687 = vtanh.f32 %v385_v26 }
  0xfa   : > { %v373_v31 = vpop.f32.mrf.mxu0 }
  0xfb   : > { %689 = vtanh.f32 %v386_v29  ;;  %v387_v33 = vmul.f32 0.5, %v373_v31 }
  0xfc   : > { %691 = vtanh.f32 %v384_v27 }
  0xfd   : > { %693 = vtanh.f32 %v387_v33 }
  0xfe   : > { %695 = vtanh.f32 %v382_v30 }
  0xff   : > { %697 = vtanh.f32 %v381_v32 }
 0x100   : > { %699 = vtanh.f32 %v380_v34 }
 0x101   : > { %701 = vtanh.f32 %v379_v35 }
 0x102   : > { %703 = vtanh.f32 %v378_v36  ;;  %v686_v39 = vpop.eup %685 }
 0x103   : > { %705 = vtanh.f32 %v377_v37  ;;  %v407_v51 = vadd.f32 1.0, %v686_v39 }
 0x104   : > { %707 = vtanh.f32 %v376_v38 }
 0x105   : > { %v419_v0 = vmul.f32 %v407_v51, %v383_v24  ;;  %709 = vtanh.f32 %v522_v15 }
 0x106   : > { %v688_v40 = vpop.eup %687 }
 0x107   : > { %v409_v46 = vadd.f32 1.0, %v688_v40 }
 0x108   : > { %v690_v41 = vpop.eup %689 }
 0x109   : > { %v692_v42 = vpop.eup %691  ;;  %v410_v44 = vadd.f32 1.0, %v690_v41  ;;  %v421_v58 = vmul.f32 %v409_v46, %v385_v26 }
 0x10a   : > { %v694_v43 = vpop.eup %693  ;;  %v408_v49 = vadd.f32 1.0, %v692_v42 }
 0x10b   : > { %v696_v45 = vpop.eup %695  ;;  %v411_v47 = vadd.f32 1.0, %v694_v43  ;;  %v422_v55 = vmul.f32 %v410_v44, %v386_v29 }
 0x10c   : > { %v698_v48 = vpop.eup %697  ;;  %v406_v54 = vadd.f32 1.0, %v696_v45  ;;  %v420_v61 = vmul.f32 %v408_v49, %v384_v27 }
 0x10d   : > { %v700_v50 = vpop.eup %699  ;;  %v423_v52 = vmul.f32 %v411_v47, %v387_v33  ;;  %v405_v57 = vadd.f32 1.0, %v698_v48 }
 0x10e   : > { %v702_v53 = vpop.eup %701  ;;  %v404_v60 = vadd.f32 1.0, %v700_v50  ;;  %v418_v2 = vmul.f32 %v406_v54, %v382_v30 }
 0x10f   : > { %v704_v56 = vpop.eup %703  ;;  %649 = vmatprep.subr.msk.mxu1 %vm433_vm2, %v423_v52  ;;  %v403_v63 = vadd.f32 1.0, %v702_v53  ;;  %v417_v5 = vmul.f32 %v405_v57, %v381_v32 }
 0x110   : > { %v706_v59 = vpop.eup %705  ;;  %650 = vmatpush1.msk.msra.mxu1 %vm433_vm2, %v422_v55  ;;  %v402_v1 = vadd.f32 1.0, %v704_v56  ;;  %v416_v7 = vmul.f32 %v404_v60, %v380_v34 }
 0x111   : > { %v708_v62 = vpop.eup %707  ;;  %462 = vmatprep.subr.mxu1 %v421_v58  ;;  %v401_v3 = vadd.f32 1.0, %v706_v59  ;;  %v415_v8 = vmul.f32 %v403_v63, %v379_v35 }
 0x112   : > { %463 = vmatpush1.msra.mxu1 %v420_v61  ;;  %v400_v6 = vadd.f32 1.0, %v708_v62  ;;  %v414_v9 = vmul.f32 %v402_v1, %v378_v36  ;;  %v710_v16 = vpop.eup %709 }
 0x113   : > { %464 = vmatprep.subr.mxu1 %v419_v0  ;;  %v413_v10 = vmul.f32 %v401_v3, %v377_v37  ;;  %v524_v17 = vadd.f32 1.0, %v710_v16 }
 0x114   : > { %465 = vmatpush1.msra.mxu1 %v418_v2  ;;  %v412_v11 = vmul.f32 %v400_v6, %v376_v38 }
 0x115   : > { %466 = vmatprep.subr.mxu1 %v417_v5 }
 0x116   : > { %467 = vmatpush1.msra.mxu1 %v416_v7 }
 0x117   : > { %468 = vmatprep.subr.mxu1 %v415_v8 }
 0x118   : > { %469 = vmatpush1.msra.mxu1 %v414_v9 }
 0x119   : > { %470 = vmatprep.subr.mxu1 %v413_v10 }
 0x11a   : > { %471 = vmatpush1.msra.mxu1 %v412_v11 }
 0x11b   : > { %651 = vmatmul.mubr.msk.f32.vlgmr.msra.gmra.mxu1 %vm426_vm3, %v424_v12 }
 0x11c   : > { %510 = vmatprep.mubr.f32.mxu1 %v735_v4  ;;  %v525_v4 = vmul.f32 %v524_v17, %v522_v15 }
 0x11f   : > { %652 = vmatmul.mubr.msk.f32.gmra.mxu1 %vm426_vm3, %v425_v13 }
 0x1db   : > { %v506_v19 = vpop.f32.mrf.mxu1 }
 0x1dc   : > { %517 = vst [vmem:[%s231_s8] sm:$0xff] %v506_v19 }
 0x1dd   : > { %v508_v20 = vpop.f32.mrf.mxu1 }
 0x1de   : > { %518 = vst [vmem:[%s231_s8 + $0x8] sm:$0xff] %v508_v20  ;;  %538 = sbr.rel (!%p792_p5) target bundleno = 491 (0x1eb), region = 63 }
 0x1df   : > { %530 = vst.msk [vmem:[%s231_s8] ss:$8 sm:$0x3] %vm528_vm4, %v525_v4  ;;  %v512_v21 = vpop.f32.mrf.mxu1 }
 0x1e0   : > { %519 = vst [vmem:[%s231_s8 + $0x10] sm:$0x1] %v512_v21 }
 0x1e1   : > { %v514_v22 = vpop.f32.mrf.mxu1 }
 0x1e2   : > { %520 = vst [vmem:[%s231_s8 + $0x18] sm:$0x1] %v514_v22 }
 0x1e6   : > { %v554_v23 = vld [vmem:[%s231_s8] sm:$0xff]  ;;  %v556_v24 = vld [vmem:[%s231_s8 + $0x8] sm:$0xff] }
 0x1e7   : > { %v558_v25 = vld [vmem:[%s231_s8 + $0x10] sm:$0xff]  ;;  %555 = vst [vmem:[%s541_s6] sm:$0xff] %v554_v23  ;;  %557 = vst [vmem:[%s541_s6 + $0x8] sm:$0xff] %v556_v24 }
 0x1e8   : > { %559 = vst [vmem:[%s541_s6 + $0x20] sm:$0xff] %v558_v25 }
 0x1e9   : > { %v560_v26 = vld [vmem:[%s231_s8 + $0x18] sm:$0xff] }
 0x1ea   : > { %561 = vst [vmem:[%s541_s6 + $0x28] sm:$0xff] %v560_v26 }
 0x1eb PF: > { %p11_p11 = scmp.ge.s32.totalorder %s780_s19, 4   ;;  %s873_s15 = smov %s729_s16 }
 0x1ec   : > { %s874_s16 = smov %s790_s22  ;;  %s875_s17 = smov %s780_s19 }
 0x1ed   :  { %13 = sbr.rel (!%p11_p11) target bundleno = 2 (0x2), region = 120 }

</bundles_post_ra>
